<compile_context>
chip_gen: v7x
topology: tpu7x:2x2x1
jax: 0.10.0
libtpu: 0.0.40
codegen_flags: <defaults>
</compile_context>

<pallas_src>
import functools

import jax
import jax.numpy as jnp
from jax import lax
from jax.experimental import pallas as pl
from jax.experimental.pallas import tpu as pltpu


# ----------------------------------------------------------------------------
# Kernel
# ----------------------------------------------------------------------------
def _resblock_kernel(x_ref, w1_ref, b1_ref, w2_ref, b2_ref, mask_ref,
                     out_ref, src_ref, taps_ref, *, H, W):
    """One batch element: conv3x3 -> +bias -> GLU -> conv3x3 -> +bias -> +x.

    Layout: activations are (C, H*W) with the flattened spatial dim on lanes.
    taps_ref is a (9*C, H*W) im2col scratch; row block k holds the (dy,dx) tap.
    """
    C = x_ref.shape[1]
    HW = H * W

    def im2col():
        # Zero the scratch (this provides the out-of-image zero padding), then
        # lay the nine shifted taps of src_ref into row blocks so the whole
        # conv becomes ONE (Cout, 9C) x (9C, HW) MXU matmul.
        taps_ref[...] = jnp.zeros_like(taps_ref)
        for k in range(9):
            oy, ox = k // 3 - 1, k % 3 - 1          # spatial offsets in [-1, 1]
            d = oy * W + ox                          # flat-index offset of tap
            p0, c0 = max(0, -d), max(0, d)           # clipped dst / src starts
            ln = HW - abs(d)
            piece = src_ref[:, c0:c0 + ln]
            if ox != 0:
                # Kill the row-wraparound samples of the flattened shift:
                #   ox=+1 -> source column 0 is invalid, ox=-1 -> column W-1.
                mrow = 0 if ox > 0 else 1
                piece = piece * mask_ref[mrow:mrow + 1, c0:c0 + ln]
            taps_ref[k * C:(k + 1) * C, p0:p0 + ln] = piece
        return taps_ref[...]                         # (9*C, HW)

    x = x_ref[0]                                     # (C, HW), lane-dense
    src_ref[...] = x

    # conv1 (3x3, C -> 2C, BN scale pre-folded into w1) + bias, then GLU.
    h1 = jnp.dot(w1_ref[...], im2col(),
                 preferred_element_type=jnp.float32) + b1_ref[...]
    g = h1[:C, :] * jax.nn.sigmoid(h1[C:, :])        # GLU over channel halves

    # conv2 (3x3, C -> C, BN scale pre-folded into w2) + bias, then residual.
    src_ref[...] = g
    h2 = jnp.dot(w2_ref[...], im2col(),
                 preferred_element_type=jnp.float32) + b2_ref[...]

    out_ref[0] = (h2 + x).astype(out_ref.dtype)


# ----------------------------------------------------------------------------
# Wrapper (PyTorch-style NCHW in / NCHW out; reshapes only, no transposes/pads)
# ----------------------------------------------------------------------------
def _column_masks(H, W, dtype=jnp.float32):
    col = jnp.arange(H * W, dtype=jnp.int32) % W
    m_first = (col != 0).astype(dtype)       # zeroes flat columns with x == 0
    m_last = (col != W - 1).astype(dtype)    # zeroes flat columns with x == W-1
    return jnp.stack([m_first, m_last], axis=0)      # (2, H*W)


def resblock_pallas_nchw(x_nchw, kparams):
    w1m, b1, w2m, b2 = kparams
    N, C, H, W = x_nchw.shape
    HW = H * W
    C2 = 2 * C

    xf = x_nchw.reshape(N, C, HW)            # free reshape, stays in NCHW order
    masks = _column_masks(H, W, x_nchw.dtype)

    kernel = functools.partial(_resblock_kernel, H=H, W=W)

    grid_spec = pltpu.PrefetchScalarGridSpec(
        num_scalar_prefetch=0,
        grid=(N,),
        in_specs=[
            pl.BlockSpec((1, C, HW), lambda n: (n, 0, 0)),   # activations
            pl.BlockSpec((C2, 9 * C), lambda n: (0, 0)),     # w1 (BN folded)
            pl.BlockSpec((C2, 1), lambda n: (0, 0)),         # b1
            pl.BlockSpec((C, 9 * C), lambda n: (0, 0)),      # w2 (BN folded)
            pl.BlockSpec((C, 1), lambda n: (0, 0)),          # b2
            pl.BlockSpec((2, HW), lambda n: (0, 0)),         # column masks
        ],
        out_specs=pl.BlockSpec((1, C, HW), lambda n: (n, 0, 0)),
        scratch_shapes=[
            pltpu.VMEM((C, HW), jnp.float32),        # conv input (x, then GLU)
            pltpu.VMEM((9 * C, HW), jnp.float32),    # im2col taps
        ],
    )

    out = pl.pallas_call(
        kernel,
        out_shape=jax.ShapeDtypeStruct((N, C, HW), x_nchw.dtype),
        grid_spec=grid_spec,
        compiler_params=pltpu.CompilerParams(
            dimension_semantics=("parallel",),       # feeds both TCs on v7x
            vmem_limit_bytes=32 * 1024 * 1024,
        ),
    )(xf, w1m, b1, w2m, b2, masks)

    return out.reshape(N, C, H, W)


# ----------------------------------------------------------------------------
# Parameter construction (eval-mode BN folded: scale -> weights, bias kept)
# ----------------------------------------------------------------------------
def fold_bn_into_conv(w_oihw, gamma, beta, mean, var, eps=1e-5):
    s = gamma / jnp.sqrt(var + eps)
    b = beta - mean * s
    cout = w_oihw.shape[0]
    # OIHW -> (Cout, 3, 3, Cin) -> (Cout, 9*Cin); column order matches the
    # kernel's tap row order k*Cin + ci with k = ky*3 + kx.
    w_mat = jnp.transpose(w_oihw, (0, 2, 3, 1)).reshape(cout, -1)
    w_mat = w_mat * s[:, None]
    return w_mat, b[:, None]


def make_raw_params(key, C):
    C2 = 2 * C
    ks = jax.random.split(key, 10)
    w1 = jax.random.normal(ks[0], (C2, C, 3, 3), jnp.float32) * 0.1
    g1 = 1.0 + 0.1 * jax.random.normal(ks[1], (C2,), jnp.float32)
    be1 = 0.1 * jax.random.normal(ks[2], (C2,), jnp.float32)
    rm1 = 0.1 * jax.random.normal(ks[3], (C2,), jnp.float32)
    rv1 = 1.0 + 0.1 * jnp.abs(jax.random.normal(ks[4], (C2,), jnp.float32))
    w2 = jax.random.normal(ks[5], (C, C, 3, 3), jnp.float32) * 0.1
    g2 = 1.0 + 0.1 * jax.random.normal(ks[6], (C,), jnp.float32)
    be2 = 0.1 * jax.random.normal(ks[7], (C,), jnp.float32)
    rm2 = 0.1 * jax.random.normal(ks[8], (C,), jnp.float32)
    rv2 = 1.0 + 0.1 * jnp.abs(jax.random.normal(ks[9], (C,), jnp.float32))
    return (w1, g1, be1, rm1, rv1, w2, g2, be2, rm2, rv2)


def prepare_kernel_params(raw, eps=1e-5):
    w1, g1, be1, rm1, rv1, w2, g2, be2, rm2, rv2 = raw
    w1m, b1 = fold_bn_into_conv(w1, g1, be1, rm1, rv1, eps)
    w2m, b2 = fold_bn_into_conv(w2, g2, be2, rm2, rv2, eps)
    return (w1m, b1, w2m, b2)


# ----------------------------------------------------------------------------
# Pure-JAX reference (un-folded BN, lax.conv) for the correctness check.
# ----------------------------------------------------------------------------
def resblock_ref_nchw(x, w1, g1, be1, rm1, rv1, w2, g2, be2, rm2, rv2, eps=1e-5):
    dn = ("NCHW", "OIHW", "NCHW")
    C = x.shape[1]
    h1 = lax.conv_general_dilated(x, w1, (1, 1), ((1, 1), (1, 1)),
                                  dimension_numbers=dn,
                                  precision=lax.Precision.HIGHEST)
    s1 = g1 / jnp.sqrt(rv1 + eps)
    b1 = be1 - rm1 * s1
    h1 = h1 * s1[None, :, None, None] + b1[None, :, None, None]
    g = h1[:, :C] * jax.nn.sigmoid(h1[:, C:])
    h2 = lax.conv_general_dilated(g, w2, (1, 1), ((1, 1), (1, 1)),
                                  dimension_numbers=dn,
                                  precision=lax.Precision.HIGHEST)
    s2 = g2 / jnp.sqrt(rv2 + eps)
    b2 = be2 - rm2 * s2
    h2 = h2 * s2[None, :, None, None] + b2[None, :, None, None]
    return h2 + x


if __name__ == "__main__":
    N, C, H, W = 2, 4, 16, 16          # batch=2, channels=4, 16x16 spatial

    key = jax.random.PRNGKey(0)
    kx, kp = jax.random.split(key)
    x_nchw = jax.random.normal(kx, (N, C, H, W), jnp.float32)

    raw = make_raw_params(kp, C)
    kparams = prepare_kernel_params(raw)

    fwd = jax.jit(resblock_pallas_nchw)
    y = jax.block_until_ready(fwd(x_nchw, kparams))

    y_ref = resblock_ref_nchw(x_nchw, *raw)
    max_err = float(jnp.max(jnp.abs(y - y_ref)))
    assert max_err < 1e-3, f"mismatch vs reference, max abs err = {max_err}"

    print("KERNEL_OK")
</pallas_src>

<mosaic_0001>
module attributes {stable_mosaic.version = 11 : i64} {
  func.func @_resblock_kernel(%arg0: i32, %arg1: memref<1x4x256xf32, #tpu.memory_space<vmem>>, %arg2: memref<8x36xf32, #tpu.memory_space<vmem>>, %arg3: memref<8x1xf32, #tpu.memory_space<vmem>>, %arg4: memref<4x36xf32, #tpu.memory_space<vmem>>, %arg5: memref<4x1xf32, #tpu.memory_space<vmem>>, %arg6: memref<2x256xf32, #tpu.memory_space<vmem>>, %arg7: memref<1x4x256xf32, #tpu.memory_space<vmem>>, %arg8: memref<4x256xf32, #tpu.memory_space<vmem>>, %arg9: memref<36x256xf32, #tpu.memory_space<vmem>>) attributes {dimension_semantics = [#tpu.dimension_semantics<parallel>], iteration_bounds = array<i64: 2>, scalar_prefetch = 0 : i64, scratch_operands = 2 : i64, tpu.core_type = #tpu.core_type<tc>, window_params = [{transform_indices = @transform_0, window_bounds = array<i64: 1, 4, 256>}, {pipeline_mode = #tpu.pipeline_mode<synchronous>, transform_indices = @transform_1, window_bounds = array<i64: 8, 36>}, {pipeline_mode = #tpu.pipeline_mode<synchronous>, transform_indices = @transform_2, window_bounds = array<i64: 8, 1>}, {pipeline_mode = #tpu.pipeline_mode<synchronous>, transform_indices = @transform_3, window_bounds = array<i64: 4, 36>}, {pipeline_mode = #tpu.pipeline_mode<synchronous>, transform_indices = @transform_4, window_bounds = array<i64: 4, 1>}, {pipeline_mode = #tpu.pipeline_mode<synchronous>, transform_indices = @transform_5, window_bounds = array<i64: 2, 256>}, {transform_indices = @transform_6, window_bounds = array<i64: 1, 4, 256>}]} {
    %c0 = arith.constant 0 : index
    %c0_0 = arith.constant 0 : index
    %c0_1 = arith.constant 0 : index
    %0 = vector.load %arg1[%c0, %c0_0, %c0_1] : memref<1x4x256xf32, #tpu.memory_space<vmem>>, vector<1x4x256xf32>
    %1 = vector.shape_cast %0 : vector<1x4x256xf32> to vector<4x256xf32>
    %c0_2 = arith.constant 0 : index
    %c0_3 = arith.constant 0 : index
    %2 = vector.load %arg8[%c0_2, %c0_3] : memref<4x256xf32, #tpu.memory_space<vmem>>, vector<4x256xf32>
    tpu.vector_store %arg8[%c0_2, %c0_3], %1 {strides = array<i32>} : memref<4x256xf32, #tpu.memory_space<vmem>>, vector<4x256xf32>,
    %c0_4 = arith.constant 0 : index
    %c0_5 = arith.constant 0 : index
    %3 = vector.load %arg2[%c0_4, %c0_5] : memref<8x36xf32, #tpu.memory_space<vmem>>, vector<8x36xf32>
    %cst = arith.constant 0.000000e+00 : f32
    %4 = vector.broadcast %cst : f32 to vector<36x256xf32>
    %c0_6 = arith.constant 0 : index
    %c0_7 = arith.constant 0 : index
    %5 = vector.load %arg9[%c0_6, %c0_7] : memref<36x256xf32, #tpu.memory_space<vmem>>, vector<36x256xf32>
    tpu.vector_store %arg9[%c0_6, %c0_7], %4 {strides = array<i32>} : memref<36x256xf32, #tpu.memory_space<vmem>>, vector<36x256xf32>,
    %c0_8 = arith.constant 0 : index
    %c0_9 = arith.constant 0 : index
    %6 = vector.load %arg8[%c0_8, %c0_9] : memref<4x256xf32, #tpu.memory_space<vmem>>, vector<4x239xf32>
    %c1 = arith.constant 1 : index
    %c0_10 = arith.constant 0 : index
    %7 = vector.load %arg6[%c1, %c0_10] : memref<2x256xf32, #tpu.memory_space<vmem>>, vector<1x239xf32>
    %8 = vector.broadcast %7 : vector<1x239xf32> to vector<4x239xf32>
    %9 = arith.mulf %6, %8 : vector<4x239xf32>
    %c0_11 = arith.constant 0 : index
    %c17 = arith.constant 17 : index
    %10 = vector.load %arg9[%c0_11, %c17] : memref<36x256xf32, #tpu.memory_space<vmem>>, vector<4x239xf32>
    tpu.vector_store %arg9[%c0_11, %c17], %9 {strides = array<i32>} : memref<36x256xf32, #tpu.memory_space<vmem>>, vector<4x239xf32>,
    %c0_12 = arith.constant 0 : index
    %c0_13 = arith.constant 0 : index
    %11 = vector.load %arg8[%c0_12, %c0_13] : memref<4x256xf32, #tpu.memory_space<vmem>>, vector<4x240xf32>
    %c4 = arith.constant 4 : index
    %c16 = arith.constant 16 : index
    %12 = vector.load %arg9[%c4, %c16] : memref<36x256xf32, #tpu.memory_space<vmem>>, vector<4x240xf32>
    tpu.vector_store %arg9[%c4, %c16], %11 {strides = array<i32>} : memref<36x256xf32, #tpu.memory_space<vmem>>, vector<4x240xf32>,
    %c0_14 = arith.constant 0 : index
    %c0_15 = arith.constant 0 : index
    %13 = vector.load %arg8[%c0_14, %c0_15] : memref<4x256xf32, #tpu.memory_space<vmem>>, vector<4x241xf32>
    %c0_16 = arith.constant 0 : index
    %c0_17 = arith.constant 0 : index
    %14 = vector.load %arg6[%c0_16, %c0_17] : memref<2x256xf32, #tpu.memory_space<vmem>>, vector<1x241xf32>
    %15 = vector.broadcast %14 : vector<1x241xf32> to vector<4x241xf32>
    %16 = arith.mulf %13, %15 : vector<4x241xf32>
    %c8 = arith.constant 8 : index
    %c15 = arith.constant 15 : index
    %17 = vector.load %arg9[%c8, %c15] : memref<36x256xf32, #tpu.memory_space<vmem>>, vector<4x241xf32>
    tpu.vector_store %arg9[%c8, %c15], %16 {strides = array<i32>} : memref<36x256xf32, #tpu.memory_space<vmem>>, vector<4x241xf32>,
    %c0_18 = arith.constant 0 : index
    %c0_19 = arith.constant 0 : index
    %18 = vector.load %arg8[%c0_18, %c0_19] : memref<4x256xf32, #tpu.memory_space<vmem>>, vector<4x255xf32>
    %c1_20 = arith.constant 1 : index
    %c0_21 = arith.constant 0 : index
    %19 = vector.load %arg6[%c1_20, %c0_21] : memref<2x256xf32, #tpu.memory_space<vmem>>, vector<1x255xf32>
    %20 = vector.broadcast %19 : vector<1x255xf32> to vector<4x255xf32>
    %21 = arith.mulf %18, %20 : vector<4x255xf32>
    %c12 = arith.constant 12 : index
    %c1_22 = arith.constant 1 : index
    %22 = vector.load %arg9[%c12, %c1_22] : memref<36x256xf32, #tpu.memory_space<vmem>>, vector<4x255xf32>
    tpu.vector_store %arg9[%c12, %c1_22], %21 {strides = array<i32>} : memref<36x256xf32, #tpu.memory_space<vmem>>, vector<4x255xf32>,
    %c0_23 = arith.constant 0 : index
    %c0_24 = arith.constant 0 : index
    %23 = vector.load %arg8[%c0_23, %c0_24] : memref<4x256xf32, #tpu.memory_space<vmem>>, vector<4x256xf32>
    %c16_25 = arith.constant 16 : index
    %c0_26 = arith.constant 0 : index
    %24 = vector.load %arg9[%c16_25, %c0_26] : memref<36x256xf32, #tpu.memory_space<vmem>>, vector<4x256xf32>
    tpu.vector_store %arg9[%c16_25, %c0_26], %23 {strides = array<i32>} : memref<36x256xf32, #tpu.memory_space<vmem>>, vector<4x256xf32>,
    %c0_27 = arith.constant 0 : index
    %c1_28 = arith.constant 1 : index
    %25 = vector.load %arg8[%c0_27, %c1_28] : memref<4x256xf32, #tpu.memory_space<vmem>>, vector<4x255xf32>
    %c0_29 = arith.constant 0 : index
    %c1_30 = arith.constant 1 : index
    %26 = vector.load %arg6[%c0_29, %c1_30] : memref<2x256xf32, #tpu.memory_space<vmem>>, vector<1x255xf32>
    %27 = vector.broadcast %26 : vector<1x255xf32> to vector<4x255xf32>
    %28 = arith.mulf %25, %27 : vector<4x255xf32>
    %c20 = arith.constant 20 : index
    %c0_31 = arith.constant 0 : index
    %29 = vector.load %arg9[%c20, %c0_31] : memref<36x256xf32, #tpu.memory_space<vmem>>, vector<4x255xf32>
    tpu.vector_store %arg9[%c20, %c0_31], %28 {strides = array<i32>} : memref<36x256xf32, #tpu.memory_space<vmem>>, vector<4x255xf32>,
    %c0_32 = arith.constant 0 : index
    %c15_33 = arith.constant 15 : index
    %30 = vector.load %arg8[%c0_32, %c15_33] : memref<4x256xf32, #tpu.memory_space<vmem>>, vector<4x241xf32>
    %c1_34 = arith.constant 1 : index
    %c15_35 = arith.constant 15 : index
    %31 = vector.load %arg6[%c1_34, %c15_35] : memref<2x256xf32, #tpu.memory_space<vmem>>, vector<1x241xf32>
    %32 = vector.broadcast %31 : vector<1x241xf32> to vector<4x241xf32>
    %33 = arith.mulf %30, %32 : vector<4x241xf32>
    %c24 = arith.constant 24 : index
    %c0_36 = arith.constant 0 : index
    %34 = vector.load %arg9[%c24, %c0_36] : memref<36x256xf32, #tpu.memory_space<vmem>>, vector<4x241xf32>
    tpu.vector_store %arg9[%c24, %c0_36], %33 {strides = array<i32>} : memref<36x256xf32, #tpu.memory_space<vmem>>, vector<4x241xf32>,
    %c0_37 = arith.constant 0 : index
    %c16_38 = arith.constant 16 : index
    %35 = vector.load %arg8[%c0_37, %c16_38] : memref<4x256xf32, #tpu.memory_space<vmem>>, vector<4x240xf32>
    %c28 = arith.constant 28 : index
    %c0_39 = arith.constant 0 : index
    %36 = vector.load %arg9[%c28, %c0_39] : memref<36x256xf32, #tpu.memory_space<vmem>>, vector<4x240xf32>
    tpu.vector_store %arg9[%c28, %c0_39], %35 {strides = array<i32>} : memref<36x256xf32, #tpu.memory_space<vmem>>, vector<4x240xf32>,
    %c0_40 = arith.constant 0 : index
    %c17_41 = arith.constant 17 : index
    %37 = vector.load %arg8[%c0_40, %c17_41] : memref<4x256xf32, #tpu.memory_space<vmem>>, vector<4x239xf32>
    %c0_42 = arith.constant 0 : index
    %c17_43 = arith.constant 17 : index
    %38 = vector.load %arg6[%c0_42, %c17_43] : memref<2x256xf32, #tpu.memory_space<vmem>>, vector<1x239xf32>
    %39 = vector.broadcast %38 : vector<1x239xf32> to vector<4x239xf32>
    %40 = arith.mulf %37, %39 : vector<4x239xf32>
    %c32 = arith.constant 32 : index
    %c0_44 = arith.constant 0 : index
    %41 = vector.load %arg9[%c32, %c0_44] : memref<36x256xf32, #tpu.memory_space<vmem>>, vector<4x239xf32>
    tpu.vector_store %arg9[%c32, %c0_44], %40 {strides = array<i32>} : memref<36x256xf32, #tpu.memory_space<vmem>>, vector<4x239xf32>,
    %c0_45 = arith.constant 0 : index
    %c0_46 = arith.constant 0 : index
    %42 = vector.load %arg9[%c0_45, %c0_46] : memref<36x256xf32, #tpu.memory_space<vmem>>, vector<36x256xf32>
    %cst_47 = arith.constant dense<0.000000e+00> : vector<8x256xf32>
    %43 = tpu.matmul %3, %42, %cst_47 {dimension_numbers = #tpu.dot_dimension_numbers<[1], [0], [0], [1], [0, 0, 1, 1], [], []>} : vector<8x36xf32>, vector<36x256xf32>, vector<8x256xf32> -> vector<8x256xf32>
    %c0_48 = arith.constant 0 : index
    %c0_49 = arith.constant 0 : index
    %44 = vector.load %arg3[%c0_48, %c0_49] : memref<8x1xf32, #tpu.memory_space<vmem>>, vector<8x1xf32>
    %45 = vector.broadcast %44 : vector<8x1xf32> to vector<8x256xf32>
    %46 = arith.addf %43, %45 : vector<8x256xf32>
    %47 = vector.extract_strided_slice %46 {offsets = [0, 0], sizes = [4, 256], strides = [1, 1]} : vector<8x256xf32> to vector<4x256xf32>
    %48 = vector.extract_strided_slice %46 {offsets = [4, 0], sizes = [4, 256], strides = [1, 1]} : vector<8x256xf32> to vector<4x256xf32>
    %49 = arith.negf %48 : vector<4x256xf32>
    %50 = math.exp %49 : vector<4x256xf32>
    %cst_50 = arith.constant 1.000000e+00 : f32
    %51 = vector.broadcast %cst_50 : f32 to vector<4x256xf32>
    %52 = arith.addf %51, %50 : vector<4x256xf32>
    %53 = arith.divf %51, %52 : vector<4x256xf32>
    %54 = arith.mulf %47, %53 : vector<4x256xf32>
    %c0_51 = arith.constant 0 : index
    %c0_52 = arith.constant 0 : index
    %55 = vector.load %arg8[%c0_51, %c0_52] : memref<4x256xf32, #tpu.memory_space<vmem>>, vector<4x256xf32>
    tpu.vector_store %arg8[%c0_51, %c0_52], %54 {strides = array<i32>} : memref<4x256xf32, #tpu.memory_space<vmem>>, vector<4x256xf32>,
    %c0_53 = arith.constant 0 : index
    %c0_54 = arith.constant 0 : index
    %56 = vector.load %arg4[%c0_53, %c0_54] : memref<4x36xf32, #tpu.memory_space<vmem>>, vector<4x36xf32>
    %cst_55 = arith.constant 0.000000e+00 : f32
    %57 = vector.broadcast %cst_55 : f32 to vector<36x256xf32>
    %c0_56 = arith.constant 0 : index
    %c0_57 = arith.constant 0 : index
    %58 = vector.load %arg9[%c0_56, %c0_57] : memref<36x256xf32, #tpu.memory_space<vmem>>, vector<36x256xf32>
    tpu.vector_store %arg9[%c0_56, %c0_57], %57 {strides = array<i32>} : memref<36x256xf32, #tpu.memory_space<vmem>>, vector<36x256xf32>,
    %c0_58 = arith.constant 0 : index
    %c0_59 = arith.constant 0 : index
    %59 = vector.load %arg8[%c0_58, %c0_59] : memref<4x256xf32, #tpu.memory_space<vmem>>, vector<4x239xf32>
    %c1_60 = arith.constant 1 : index
    %c0_61 = arith.constant 0 : index
    %60 = vector.load %arg6[%c1_60, %c0_61] : memref<2x256xf32, #tpu.memory_space<vmem>>, vector<1x239xf32>
    %61 = vector.broadcast %60 : vector<1x239xf32> to vector<4x239xf32>
    %62 = arith.mulf %59, %61 : vector<4x239xf32>
    %c0_62 = arith.constant 0 : index
    %c17_63 = arith.constant 17 : index
    %63 = vector.load %arg9[%c0_62, %c17_63] : memref<36x256xf32, #tpu.memory_space<vmem>>, vector<4x239xf32>
    tpu.vector_store %arg9[%c0_62, %c17_63], %62 {strides = array<i32>} : memref<36x256xf32, #tpu.memory_space<vmem>>, vector<4x239xf32>,
    %c0_64 = arith.constant 0 : index
    %c0_65 = arith.constant 0 : index
    %64 = vector.load %arg8[%c0_64, %c0_65] : memref<4x256xf32, #tpu.memory_space<vmem>>, vector<4x240xf32>
    %c4_66 = arith.constant 4 : index
    %c16_67 = arith.constant 16 : index
    %65 = vector.load %arg9[%c4_66, %c16_67] : memref<36x256xf32, #tpu.memory_space<vmem>>, vector<4x240xf32>
    tpu.vector_store %arg9[%c4_66, %c16_67], %64 {strides = array<i32>} : memref<36x256xf32, #tpu.memory_space<vmem>>, vector<4x240xf32>,
    %c0_68 = arith.constant 0 : index
    %c0_69 = arith.constant 0 : index
    %66 = vector.load %arg8[%c0_68, %c0_69] : memref<4x256xf32, #tpu.memory_space<vmem>>, vector<4x241xf32>
    %c0_70 = arith.constant 0 : index
    %c0_71 = arith.constant 0 : index
    %67 = vector.load %arg6[%c0_70, %c0_71] : memref<2x256xf32, #tpu.memory_space<vmem>>, vector<1x241xf32>
    %68 = vector.broadcast %67 : vector<1x241xf32> to vector<4x241xf32>
    %69 = arith.mulf %66, %68 : vector<4x241xf32>
    %c8_72 = arith.constant 8 : index
    %c15_73 = arith.constant 15 : index
    %70 = vector.load %arg9[%c8_72, %c15_73] : memref<36x256xf32, #tpu.memory_space<vmem>>, vector<4x241xf32>
    tpu.vector_store %arg9[%c8_72, %c15_73], %69 {strides = array<i32>} : memref<36x256xf32, #tpu.memory_space<vmem>>, vector<4x241xf32>,
    %c0_74 = arith.constant 0 : index
    %c0_75 = arith.constant 0 : index
    %71 = vector.load %arg8[%c0_74, %c0_75] : memref<4x256xf32, #tpu.memory_space<vmem>>, vector<4x255xf32>
    %c1_76 = arith.constant 1 : index
    %c0_77 = arith.constant 0 : index
    %72 = vector.load %arg6[%c1_76, %c0_77] : memref<2x256xf32, #tpu.memory_space<vmem>>, vector<1x255xf32>
    %73 = vector.broadcast %72 : vector<1x255xf32> to vector<4x255xf32>
    %74 = arith.mulf %71, %73 : vector<4x255xf32>
    %c12_78 = arith.constant 12 : index
    %c1_79 = arith.constant 1 : index
    %75 = vector.load %arg9[%c12_78, %c1_79] : memref<36x256xf32, #tpu.memory_space<vmem>>, vector<4x255xf32>
    tpu.vector_store %arg9[%c12_78, %c1_79], %74 {strides = array<i32>} : memref<36x256xf32, #tpu.memory_space<vmem>>, vector<4x255xf32>,
    %c0_80 = arith.constant 0 : index
    %c0_81 = arith.constant 0 : index
    %76 = vector.load %arg8[%c0_80, %c0_81] : memref<4x256xf32, #tpu.memory_space<vmem>>, vector<4x256xf32>
    %c16_82 = arith.constant 16 : index
    %c0_83 = arith.constant 0 : index
    %77 = vector.load %arg9[%c16_82, %c0_83] : memref<36x256xf32, #tpu.memory_space<vmem>>, vector<4x256xf32>
    tpu.vector_store %arg9[%c16_82, %c0_83], %76 {strides = array<i32>} : memref<36x256xf32, #tpu.memory_space<vmem>>, vector<4x256xf32>,
    %c0_84 = arith.constant 0 : index
    %c1_85 = arith.constant 1 : index
    %78 = vector.load %arg8[%c0_84, %c1_85] : memref<4x256xf32, #tpu.memory_space<vmem>>, vector<4x255xf32>
    %c0_86 = arith.constant 0 : index
    %c1_87 = arith.constant 1 : index
    %79 = vector.load %arg6[%c0_86, %c1_87] : memref<2x256xf32, #tpu.memory_space<vmem>>, vector<1x255xf32>
    %80 = vector.broadcast %79 : vector<1x255xf32> to vector<4x255xf32>
    %81 = arith.mulf %78, %80 : vector<4x255xf32>
    %c20_88 = arith.constant 20 : index
    %c0_89 = arith.constant 0 : index
    %82 = vector.load %arg9[%c20_88, %c0_89] : memref<36x256xf32, #tpu.memory_space<vmem>>, vector<4x255xf32>
    tpu.vector_store %arg9[%c20_88, %c0_89], %81 {strides = array<i32>} : memref<36x256xf32, #tpu.memory_space<vmem>>, vector<4x255xf32>,
    %c0_90 = arith.constant 0 : index
    %c15_91 = arith.constant 15 : index
    %83 = vector.load %arg8[%c0_90, %c15_91] : memref<4x256xf32, #tpu.memory_space<vmem>>, vector<4x241xf32>
    %c1_92 = arith.constant 1 : index
    %c15_93 = arith.constant 15 : index
    %84 = vector.load %arg6[%c1_92, %c15_93] : memref<2x256xf32, #tpu.memory_space<vmem>>, vector<1x241xf32>
    %85 = vector.broadcast %84 : vector<1x241xf32> to vector<4x241xf32>
    %86 = arith.mulf %83, %85 : vector<4x241xf32>
    %c24_94 = arith.constant 24 : index
    %c0_95 = arith.constant 0 : index
    %87 = vector.load %arg9[%c24_94, %c0_95] : memref<36x256xf32, #tpu.memory_space<vmem>>, vector<4x241xf32>
    tpu.vector_store %arg9[%c24_94, %c0_95], %86 {strides = array<i32>} : memref<36x256xf32, #tpu.memory_space<vmem>>, vector<4x241xf32>,
    %c0_96 = arith.constant 0 : index
    %c16_97 = arith.constant 16 : index
    %88 = vector.load %arg8[%c0_96, %c16_97] : memref<4x256xf32, #tpu.memory_space<vmem>>, vector<4x240xf32>
    %c28_98 = arith.constant 28 : index
    %c0_99 = arith.constant 0 : index
    %89 = vector.load %arg9[%c28_98, %c0_99] : memref<36x256xf32, #tpu.memory_space<vmem>>, vector<4x240xf32>
    tpu.vector_store %arg9[%c28_98, %c0_99], %88 {strides = array<i32>} : memref<36x256xf32, #tpu.memory_space<vmem>>, vector<4x240xf32>,
    %c0_100 = arith.constant 0 : index
    %c17_101 = arith.constant 17 : index
    %90 = vector.load %arg8[%c0_100, %c17_101] : memref<4x256xf32, #tpu.memory_space<vmem>>, vector<4x239xf32>
    %c0_102 = arith.constant 0 : index
    %c17_103 = arith.constant 17 : index
    %91 = vector.load %arg6[%c0_102, %c17_103] : memref<2x256xf32, #tpu.memory_space<vmem>>, vector<1x239xf32>
    %92 = vector.broadcast %91 : vector<1x239xf32> to vector<4x239xf32>
    %93 = arith.mulf %90, %92 : vector<4x239xf32>
    %c32_104 = arith.constant 32 : index
    %c0_105 = arith.constant 0 : index
    %94 = vector.load %arg9[%c32_104, %c0_105] : memref<36x256xf32, #tpu.memory_space<vmem>>, vector<4x239xf32>
    tpu.vector_store %arg9[%c32_104, %c0_105], %93 {strides = array<i32>} : memref<36x256xf32, #tpu.memory_space<vmem>>, vector<4x239xf32>,
    %c0_106 = arith.constant 0 : index
    %c0_107 = arith.constant 0 : index
    %95 = vector.load %arg9[%c0_106, %c0_107] : memref<36x256xf32, #tpu.memory_space<vmem>>, vector<36x256xf32>
    %cst_108 = arith.constant dense<0.000000e+00> : vector<4x256xf32>
    %96 = tpu.matmul %56, %95, %cst_108 {dimension_numbers = #tpu.dot_dimension_numbers<[1], [0], [0], [1], [0, 0, 1, 1], [], []>} : vector<4x36xf32>, vector<36x256xf32>, vector<4x256xf32> -> vector<4x256xf32>
    %c0_109 = arith.constant 0 : index
    %c0_110 = arith.constant 0 : index
    %97 = vector.load %arg5[%c0_109, %c0_110] : memref<4x1xf32, #tpu.memory_space<vmem>>, vector<4x1xf32>
    %98 = vector.broadcast %97 : vector<4x1xf32> to vector<4x256xf32>
    %99 = arith.addf %96, %98 : vector<4x256xf32>
    %100 = arith.addf %99, %1 : vector<4x256xf32>
    %c0_111 = arith.constant 0 : index
    %c0_112 = arith.constant 0 : index
    %c0_113 = arith.constant 0 : index
    %101 = vector.load %arg7[%c0_111, %c0_112, %c0_113] : memref<1x4x256xf32, #tpu.memory_space<vmem>>, vector<1x4x256xf32>
    %102 = vector.shape_cast %101 : vector<1x4x256xf32> to vector<4x256xf32>
    %103 = vector.shape_cast %100 : vector<4x256xf32> to vector<1x4x256xf32>
    tpu.vector_store %arg7[%c0_111, %c0_112, %c0_113], %103 {strides = array<i32>} : memref<1x4x256xf32, #tpu.memory_space<vmem>>, vector<1x4x256xf32>,
    return
  }
  func.func @transform_0(%arg0: i32) -> (i32, i32, i32) {
    %c0_i32 = arith.constant 0 : i32
    %c0_i32_0 = arith.constant 0 : i32
    %c0_i32_1 = arith.constant 0 : i32
    return %arg0, %c0_i32, %c0_i32_0 : i32, i32, i32
  }
  func.func @transform_1(%arg0: i32) -> (i32, i32) {
    %c0_i32 = arith.constant 0 : i32
    %c0_i32_0 = arith.constant 0 : i32
    %c0_i32_1 = arith.constant 0 : i32
    return %c0_i32, %c0_i32_0 : i32, i32
  }
  func.func @transform_2(%arg0: i32) -> (i32, i32) {
    %c0_i32 = arith.constant 0 : i32
    %c0_i32_0 = arith.constant 0 : i32
    %c0_i32_1 = arith.constant 0 : i32
    return %c0_i32, %c0_i32_0 : i32, i32
  }
  func.func @transform_3(%arg0: i32) -> (i32, i32) {
    %c0_i32 = arith.constant 0 : i32
    %c0_i32_0 = arith.constant 0 : i32
    %c0_i32_1 = arith.constant 0 : i32
    return %c0_i32, %c0_i32_0 : i32, i32
  }
  func.func @transform_4(%arg0: i32) -> (i32, i32) {
    %c0_i32 = arith.constant 0 : i32
    %c0_i32_0 = arith.constant 0 : i32
    %c0_i32_1 = arith.constant 0 : i32
    return %c0_i32, %c0_i32_0 : i32, i32
  }
  func.func @transform_5(%arg0: i32) -> (i32, i32) {
    %c0_i32 = arith.constant 0 : i32
    %c0_i32_0 = arith.constant 0 : i32
    %c0_i32_1 = arith.constant 0 : i32
    return %c0_i32, %c0_i32_0 : i32, i32
  }
  func.func @transform_6(%arg0: i32) -> (i32, i32, i32) {
    %c0_i32 = arith.constant 0 : i32
    %c0_i32_0 = arith.constant 0 : i32
    %c0_i32_1 = arith.constant 0 : i32
    return %arg0, %c0_i32, %c0_i32_0 : i32, i32, i32
  }
}

</mosaic_0001>

<bundles_post_ra>
// kernel: resblock_pallas_nchw.1
= control target key start
LH: loop header
LB: loop body
LE: loop exit
PB: predicated region body
PF: predicated region fallthrough
CT: control target
= control target key end

     0   :  { %s1063_s21 = smov 0   ;;  %s1281_s0 = inlined_call_operand.vmem [shape: f32[2,4,256], index: 0, kind: input, shape index: {}]   ;;  %s1282_s1 = inlined_call_operand.vmem [shape: f32[8,36], index: 1, kind: input, shape index: {}]   ;;  %s1283_s2 = inlined_call_operand.vmem [shape: f32[8,1], index: 2, kind: input, shape index: {}]   ;;  %s1284_s3 = inlined_call_operand.vmem [shape: f32[4,36], index: 3, kind: input, shape index: {}]   ;;  %s1285_s4 = inlined_call_operand.vmem [shape: f32[4,1], index: 4, kind: input, shape index: {}]   ;;  %s1286_s5 = inlined_call_operand.vmem [shape: f32[2,256], index: 5, kind: input, shape index: {}]   ;;  %s1287_s6 = inlined_call_operand.vmem [shape: f32[2,4,256], index: 6, kind: output, shape index: {}]  }
   0x1 LB: > { %s937_s22 = sadd.s32 4294967295, %s1016_s21   ;;  %p941_p0 = scmp.ge.s32.totalorder %s1016_s21, 1  ;;  %s1016_s21 = sphi %s1063_s21, %s16_s21  }
   0x2   : > { %p212_p1 = scmp.lt.s32.totalorder %s1016_s21, 3 }
   0x4   : > { %p213_p2 = pnand %p941_p0, %p212_p1 }
   0x5   : > { %p1071_p3 = scmp.lt.s32.totalorder (!%p213_p2), %s937_s22, 1  ;;  %v269_v0 = vlaneseq (!%p213_p2)  ;;  %v1018_v1 = vmov (!%p213_p2), 0.0   ;;  %v946_v3 = vld [vmem:[%s1286_s5 + $0x1] ss:$2 sm:$0x3] (!%p213_p2)  ;;  %s1019_s10 = smov (!%p213_p2), 16  }
   0x6   : > { %216 = sbr.rel (%p213_p2) target bundleno = 800 (0x320), region = 44  ;;  %255 = vst [vmem:[#allocation3] sm:$0xff] (!%p213_p2), %v1018_v1  ;;  %256 = vst [vmem:[#allocation3 + $0x8] sm:$0xff] (!%p213_p2), %v1018_v1  ;;  %553 = vmatprep.mubr.f32.mxu0 (!%p213_p2), %v1018_v1  ;;  %865 = vmatprep.mubr.f32.mxu1 (!%p213_p2), %v1018_v1  ;;  %v947_v4 = vld [vmem:[%s1286_s5 + $0x1] ss:$2 sm:$0x3] (!%p213_p2) }
   0x7   : > { %257 = vst [vmem:[#allocation3 + $0x10] sm:$0xff] (!%p213_p2), %v1018_v1  ;;  %258 = vst [vmem:[#allocation3 + $0x18] sm:$0xff] (!%p213_p2), %v1018_v1  ;;  %v270_v2 = vshrl.u32 (!%p213_p2), %v269_v0, 7  ;;  %v308_v7 = vld [vmem:[%s1286_s5] ss:$2 sm:$0x3] (!%p213_p2) }
   0x8   : > { %259 = vst [vmem:[#allocation3 + $0x20] sm:$0xff] (!%p213_p2), %v1018_v1  ;;  %260 = vst [vmem:[#allocation3 + $0x28] sm:$0xff] (!%p213_p2), %v1018_v1  ;;  %v368_v16 = vld [vmem:[%s1286_s5] ss:$2 sm:$0x3] (!%p213_p2)  ;;  %s1020_s15 = smov (!%p213_p2), 17  }
   0x9   : > { %261 = vst [vmem:[#allocation3 + $0x30] sm:$0xff] (!%p213_p2), %v1018_v1  ;;  %262 = vst [vmem:[#allocation3 + $0x38] sm:$0xff] (!%p213_p2), %v1018_v1  ;;  %v1098_v5 = vsub.s32 (!%p213_p2), 0, %v270_v2  ;;  %v1100_v6 = vsub.s32 (!%p213_p2), 1, %v270_v2  ;;  %s1021_s16 = smov (!%p213_p2), 1   ;;  %s1022_s17 = smov (!%p213_p2), 15  }
   0xa   : > { %263 = vst [vmem:[#allocation3 + $0x40] sm:$0xf] (!%p213_p2), %v1018_v1  ;;  %264 = vst [vmem:[#allocation3 + $0x48] sm:$0xf] (!%p213_p2), %v1018_v1  ;;  %s1023_s20 = smov (!%p213_p2), 127   ;;  %s1024_s23 = smov (!%p213_p2), 113  }
   0xb   : > { %v272_v9 = vrot.slane (!%p213_p2), %v946_v3, %v1098_v5  ;;  %v276_v10 = vrot.slane (!%p213_p2), %v946_v3, %v1100_v6  ;;  %v340_v11 = vrot.slane (!%p213_p2), %v947_v4, %v1098_v5  ;;  %v344_v12 = vrot.slane (!%p213_p2), %v947_v4, %v1100_v6  ;;  %v948_v17 = vld [vmem:[%s1286_s5 + $0x1] ss:$2 sm:$0x3] (!%p213_p2)  ;;  %v436_v33 = vld [vmem:[%s1286_s5] ss:$2 sm:$0x3] (!%p213_p2) }
   0xc   : > { %v313_v14 = vrot.slane (!%p213_p2), %v308_v7, %v1098_v5  ;;  %v317_v15 = vrot.slane (!%p213_p2), %v308_v7, %v1100_v6  ;;  %v373_v22 = vrot.slane (!%p213_p2), %v368_v16, %v1098_v5  ;;  %v377_v23 = vrot.slane (!%p213_p2), %v368_v16, %v1100_v6  ;;  %s1025_s24 = smov (!%p213_p2), 112   ;;  %s1026_s25 = smov (!%p213_p2), 111   ;;  %v472_v45 = vld [vmem:[%s1283_s2] sm:$0xff] (!%p213_p2) }
   0xd   : > { %s1294_s22 = smov (!%p1071_p3, %s937_s22), 1  ;;  %v277_v18 = vcombine.low %v272_v9, %v276_v10  ;;  %v345_v19 = vcombine.low %v340_v11, %v344_v12  ;;  %v400_v24 = vrot.slane %v948_v17, %v1098_v5  ;;  %v404_v27 = vrot.slane %v948_v17, %v1100_v6 }
   0xe   : > { %s962_s28 = sshll.u32 %s1294_s22, 3  ;;  %v318_v20 = vcombine.low %v313_v14, %v317_v15  ;;  %v378_v30 = vcombine.low %v373_v22, %v377_v23  ;;  %v441_v36 = vrot.slane %v436_v33, %v1098_v5  ;;  %v445_v37 = vrot.slane %v436_v33, %v1100_v6 }
   0xf   : > { %s246_s9 = scalar_lea.vmem %s1281_s0, %s962_s28  ;;  %v405_v31 = vcombine.low %v400_v24, %v404_v27  ;;  %v1027_v44 = vmov 0   ;;  %vm300_vm0 = vcmask 130048   ;;  %vm304_vm1 = vcmask 1047684   ;;  %v254_v24 = vld [vmem:[%s1282_s1] sm:$0xff] }
  0x10   : > { %v1110_v8 = vld [vmem:[%s246_s9] sm:$0xff]  ;;  %v446_v40 = vcombine.low %v441_v36, %v445_v37  ;;  %1000 = vset.pattern.permute.xlu0 %v1027_v44  ;;  %vm290_vm2 = vcmask 1043592   ;;  %vm331_vm3 = vcmask 1043576   ;;  %vm327_vm4 = vcmask 121856  }
  0x11   : > { %298 = vrot.lane.b32.xlu1 %v1110_v8, %s1019_s10  ;;  %v295_v13 = vcombine.low %v1110_v8, %v1110_v8  ;;  %365 = vst [vmem:[#allocation3 + $0x20] sm:$0xf] %v1110_v8  ;;  %v279_v21 = vmul.f32 %v277_v18, %v1110_v8  ;;  %v347_v25 = vmul.f32 %v345_v19, %v1110_v8  ;;  %vm286_vm5 = vcmask 138240   ;;  %v634_v36 = vld [vmem:[%s1286_s5] ss:$2 sm:$0x3] }
  0x12   : > { %v320_v26 = vmul.f32 %v318_v20, %v1110_v8  ;;  %v1139_v28 = vcombine.high %v1110_v8, %v1110_v8  ;;  %v380_v34 = vmul.f32 %v378_v30, %v1110_v8  ;;  %v407_v35 = vmul.f32 %v405_v31, %v1110_v8  ;;  %v954_v37 = vld [vmem:[%s1286_s5 + $0x1] ss:$2 sm:$0x3] }
  0x13   : > { %282 = vrot.lane.b32.xlu0 %v279_v21, %s1020_s15  ;;  %v281_v32 = vcombine.high %v279_v21, %v279_v21  ;;  %v349_v38 = vcombine.low %v347_v25, %v347_v25  ;;  %v448_v42 = vmul.f32 %v446_v40, %v1110_v8  ;;  %vm392_vm6 = vcmask 1039364  }
  0x14   : > { %366 = vst [vmem:[#allocation3 + $0x28] sm:$0xf] %v1139_v28  ;;  %v322_v29 = vcombine.high %v320_v26, %v320_v26  ;;  %v409_v39 = vcombine.high %v407_v35, %v407_v35  ;;  %v382_v41 = vcombine.low %v380_v34, %v380_v34  ;;  %vm354_vm7 = vcmask 7168  }
  0x15   : > { %296 = vrot.lane.b32.xlu1 %v295_v13, %s1019_s10  ;;  %v450_v43 = vcombine.high %v448_v42, %v448_v42  ;;  %vm358_vm8 = vcmask 1047564   ;;  %vm419_vm9 = vcmask 920576   ;;  %vm387_vm10 = vcmask 1039360  }
  0x16   : > { %vm433_vm11 = vcmask 916484   ;;  %vm414_vm12 = vcmask 924672   ;;  %vm1288_vm13 = vcmask 904192   ;;  %vm428_vm14 = vcmask 916480  }
  0x17   : > { %323 = vrot.lane.b32.xlu0 %v320_v26, %s1022_s17  ;;  %vm1289_vm15 = vcmask 908288   ;;  %v643_v40 = vrot.slane %v634_v36, %v1100_v6 }
  0x19   : > { %352 = vrot.lane.b32.xlu1 %v347_v25, %s1021_s16 }
  0x1b   : > { %284 = vrot.lane.b32.xlu0 %v281_v32, %s1020_s15 }
  0x1d   : > { %325 = vrot.lane.b32.xlu1 %v322_v29, %s1022_s17 }
  0x1f   : > { %350 = vrot.lane.b32.xlu0 %v349_v38, %s1021_s16 }
  0x21   : > { %385 = vrot.lane.b32.xlu1 %v380_v34, %s1023_s20 }
  0x23   : > { %383 = vrot.lane.b32.xlu0 %v382_v41, %s1023_s20 }
  0x25   : > { %412 = vrot.lane.b32.xlu1 %v409_v39, %s1024_s23  ;;  %v639_v39 = vrot.slane %v634_v36, %v1098_v5 }
  0x27   : > { %410 = vrot.lane.b32.xlu0 %v407_v35, %s1024_s23 }
  0x29   : > { %426 = vrot.lane.b32.xlu1 %v1110_v8, %s1025_s24 }
  0x2b   : > { %424 = vrot.lane.b32.xlu0 %v295_v13, %s1025_s24 }
  0x2d   : > { %453 = vrot.lane.b32.xlu1 %v450_v43, %s1026_s25  ;;  %v956_v43 = vld [vmem:[%s1286_s5 + $0x1] ss:$2 sm:$0x3] }
  0x2f   : > { %451 = vrot.lane.b32.xlu0 %v448_v42, %s1026_s25 }
  0x33   : > { %475 = vperm.xlu0 %1000, %v472_v45   ;;  %v602_v45 = vrot.slane %v954_v37, %v1098_v5 }
  0x83   : > { %v299_v46 = vpop.permute.xlu1 %298 }
  0x85   : > { %v283_v49 = vpop.permute.xlu0 %282 }
  0x86   : > { %291 = vst.msk [vmem:[#allocation3] sm:$0xf] %vm290_vm2, %v283_v49 }
  0x87   : > { %v297_v47 = vpop.permute.xlu1 %296 }
  0x88   : > { %v301_v48 = vsel %vm300_vm0, %v297_v47, %v299_v46  ;;  %305 = vst.msk [vmem:[#allocation3] sm:$0xf0] %vm304_vm1, %v297_v47  ;;  %v606_v46 = vrot.slane %v954_v37, %v1100_v6  ;;  %v955_v47 = vld [vmem:[%s1286_s5 + $0x1] ss:$2 sm:$0x3] }
  0x89   : > { %306 = vst [vmem:[#allocation3 + $0x8] sm:$0xf0] %v301_v48  ;;  %v324_v51 = vpop.permute.xlu0 %323 }
  0x8a   : > { %332 = vst.msk [vmem:[#allocation3 + $0x10] sm:$0xf] %vm331_vm3, %v324_v51 }
  0x8b   : > { %v353_v50 = vpop.permute.xlu1 %352 }
  0x8d   : > { %v285_v54 = vpop.permute.xlu0 %284 }
  0x8e   : > { %v287_v56 = vsel %vm286_vm5, %v283_v49, %v285_v54  ;;  %v664_v54 = vrot.slane %v955_v47, %v1098_v5 }
  0x8f   : > { %v326_v52 = vpop.permute.xlu1 %325  ;;  %v462_v55 = vld [vmem:[#allocation3] sm:$0xff]  ;;  %292 = vst [vmem:[#allocation3 + $0x8] sm:$0xf] %v287_v56 }
  0x90   : > { %v328_v53 = vsel %vm327_vm4, %v324_v51, %v326_v52  ;;  %586 = vst [vmem:[#allocation3] sm:$0xff] %v1018_v1  ;;  %v720_v51 = vrot.slane %v956_v43, %v1098_v5 }
  0x91   : > { %333 = vst [vmem:[#allocation3 + $0x18] sm:$0xf] %v328_v53  ;;  %v351_v58 = vpop.permute.xlu0 %350  ;;  %v724_v53 = vrot.slane %v956_v43, %v1100_v6 }
  0x92   : > { %v355_v59 = vsel %vm354_vm7, %v351_v58, %v353_v50  ;;  %359 = vst.msk [vmem:[#allocation3 + $0x10] sm:$0xf0] %vm358_vm8, %v351_v58  ;;  %v644_v50 = vcombine.low %v639_v39, %v643_v40  ;;  %v607_v58 = vcombine.low %v602_v45, %v606_v46 }
  0x93   : > { %v386_v57 = vpop.permute.xlu1 %385  ;;  %360 = vst [vmem:[#allocation3 + $0x18] sm:$0xf0] %v355_v59  ;;  %v690_v59 = vld [vmem:[%s1286_s5] ss:$2 sm:$0x3] }
  0x94   : > { %393 = vst.msk [vmem:[#allocation3 + $0x28] sm:$0xf0] %vm392_vm6, %v386_v57 }
  0x95   : > { %v384_v61 = vpop.permute.xlu0 %383 }
  0x96   : > { %v388_v62 = vsel %vm387_vm10, %v384_v61, %v386_v57  ;;  %v463_v63 = vld [vmem:[#allocation3 + $0x8] sm:$0xff]  ;;  %v725_v61 = vcombine.low %v720_v51, %v724_v53 }
  0x97   : > { %v413_v60 = vpop.permute.xlu1 %412  ;;  %391 = vst [vmem:[#allocation3 + $0x20] sm:$0xf0] %v388_v62  ;;  %587 = vst [vmem:[#allocation3 + $0x8] sm:$0xff] %v1018_v1 }
  0x98   : > { %420 = vst.msk [vmem:[#allocation3 + $0x38] sm:$0xf] %vm419_vm9, %v413_v60 }
  0x99   : > { %v411_v3 = vpop.permute.xlu0 %410  ;;  %v464_v4 = vld [vmem:[#allocation3 + $0x10] sm:$0xff] }
  0x9a   : > { %v415_v7 = vsel %vm414_vm12, %v411_v3, %v413_v60  ;;  %v465_v9 = vld [vmem:[#allocation3 + $0x18] sm:$0xff]  ;;  %588 = vst [vmem:[#allocation3 + $0x10] sm:$0xff] %v1018_v1  ;;  %v968_v11 = vpack.c.bf16 %v464_v4, %v462_v55  ;;  %v668_v55 = vrot.slane %v955_v47, %v1100_v6 }
  0x9b   : > { %v427_v0 = vpop.permute.xlu1 %426  ;;  %v467_v2 = vld [vmem:[#allocation3 + $0x28] sm:$0xff]  ;;  %418 = vst [vmem:[#allocation3 + $0x30] sm:$0xf] %v415_v7  ;;  %v966_v10 = vpack.c.bf16 %v465_v9, %v463_v63  ;;  %589 = vst [vmem:[#allocation3 + $0x18] sm:$0xff] %v1018_v1  ;;  %v695_v63 = vrot.slane %v690_v59, %v1098_v5 }
  0x9c   : > { %434 = vst.msk [vmem:[#allocation3 + $0x38] sm:$0xf0] %vm433_vm11, %v427_v0  ;;  %591 = vst [vmem:[#allocation3 + $0x28] sm:$0xff] %v1018_v1  ;;  %v669_v62 = vcombine.low %v664_v54, %v668_v55 }
  0x9d   : > { %967 = vmatprep.subr.bf16.mxu0 %v966_v10  ;;  %v425_v13 = vpop.permute.xlu0 %424 }
  0x9e   : > { %v429_v14 = vsel %vm428_vm14, %v425_v13, %v427_v0  ;;  %969 = vmatpush1.bf16.msra.mxu0 %v968_v11  ;;  %v466_v15 = vld [vmem:[#allocation3 + $0x20] sm:$0xff]  ;;  %v699_v0 = vrot.slane %v690_v59, %v1100_v6 }
  0x9f   : > { %v454_v12 = vpop.permute.xlu1 %453  ;;  %432 = vst [vmem:[#allocation3 + $0x30] sm:$0xf0] %v429_v14  ;;  %590 = vst [vmem:[#allocation3 + $0x20] sm:$0xff] %v1018_v1  ;;  %v752_v11 = vld [vmem:[%s1286_s5] ss:$2 sm:$0x3] }
  0xa0   : > { %461 = vst.msk [vmem:[#allocation3 + $0x48] sm:$0xf] %vm1288_vm13, %v454_v12  ;;  %vm482_vm13 = vcmask 1043456   ;;  %v700_v7 = vcombine.low %v695_v63, %v699_v0  ;;  %v757_v13 = vrot.slane %v752_v11, %v1098_v5  ;;  %v761_v14 = vrot.slane %v752_v11, %v1100_v6  ;;  %v786_v5 = vld [vmem:[%s1285_s4] sm:$0xf] }
  0xa1   : > { %v452_v18 = vpop.permute.xlu0 %451 }
  0xa2   : > { %v456_v19 = vsel %vm1289_vm15, %v452_v18, %v454_v12  ;;  %vm478_vm15 = vcmask 293888  }
  0xa3   : > { %v469_v16 = vld [vmem:[#allocation3 + $0x38] sm:$0xff]  ;;  %459 = vst [vmem:[#allocation3 + $0x40] sm:$0xf] %v456_v19 }
  0xa4   : > { %v970_v17 = vpack.c.bf16 %v469_v16, %v467_v2  ;;  %593 = vst [vmem:[#allocation3 + $0x38] sm:$0xff] %v1018_v1  ;;  %v762_v16 = vcombine.low %v757_v13, %v761_v14 }
  0xa6   : > { %971 = vmatprep.subr.bf16.mxu0 %v970_v17  ;;  %v468_v21 = vld [vmem:[#allocation3 + $0x30] sm:$0xff] }
  0xa7   : > { %v471_v20 = vld [vmem:[#allocation3 + $0x48] sm:$0xf]  ;;  %v972_v22 = vpack.c.bf16 %v468_v21, %v466_v15  ;;  %592 = vst [vmem:[#allocation3 + $0x30] sm:$0xff] %v1018_v1 }
  0xa8   : > { %595 = vst [vmem:[#allocation3 + $0x48] sm:$0xf] %v1018_v1 }
  0xa9   : > { %973 = vmatpush1.bf16.msra.mxu0 %v972_v22 }
  0xaa   : > { %949 = vmatprep.subr.msk.mxu0 %vm482_vm13, %v471_v20  ;;  %v470_v23 = vld [vmem:[#allocation3 + $0x40] sm:$0xf] }
  0xab   : > { %594 = vst [vmem:[#allocation3 + $0x40] sm:$0xf] %v1018_v1 }
  0xad   : > { %950 = vmatpush1.msk.msra.mxu0 %vm482_vm13, %v470_v23 }
  0xae   : > { %951 = vmatmul.mubr.msk.f32.vlgmr.msra.gmra.mrb[0].mxu0 %vm478_vm15, %v254_v24 }
  0xb2   : > { %v476_v25 = vpop.permute.xlu0 %475 }
 0x181   : > { %v555_v26 = vpop.f32.mrb[0].mxu0 }
 0x182   : > { %v556_v27 = vadd.f32 %v555_v26, %v476_v25  ;;  %v557_v29 = vpop.f32.mrb[1].mxu0 }
 0x183   : > { %v558_v30 = vadd.f32 %v557_v29, %v476_v25 }
 0x184   : > { %v952_v31 = vmul.f32 -1.442695, %v556_v27 }
 0x185   : > { %v953_v32 = vmul.f32 -1.442695, %v558_v30 }
 0x186   : > { %1002 = vpow2.f32 %v952_v31 }
 0x187   : > { %1004 = vpow2.f32 %v953_v32 }
 0x190   : > { %v1003_v33 = vpop.eup %1002 }
 0x191   : > { %v1005_v1 = vpop.eup %1004  ;;  %v566_v34 = vadd.f32 1.0, %v1003_v33 }
 0x192   : > { %v567_v35 = vadd.f32 1.0, %v1005_v1 }
 0x193   : > { %1006 = vrcp.f32 %v566_v34 }
 0x194   : > { %1008 = vrcp.f32 %v567_v35 }
 0x19d   : > { %v1007_v38 = vpop.eup %1006 }
 0x19e   : > { %v1009_v41 = vpop.eup %1008  ;;  %v574_v42 = vrot.slane %v1007_v38, 4 }
 0x19f   : > { %v575_v44 = vrot.slane %v1009_v41, 4 }
 0x1a0   : > { %v578_v48 = vmul.f32 %v574_v42, %v556_v27 }
 0x1a1   : > { %v579_v49 = vmul.f32 %v575_v44, %v558_v30 }
 0x1a2   : > { %v964_v52 = vcombine.low %v578_v48, %v578_v48 }
 0x1a3   : > { %v582_v56 = vcombine.low %v578_v48, %v579_v49  ;;  %v965_v57 = vcombine.low %v579_v49, %v579_v49 }
 0x1a4   : > { %624 = vrot.lane.b32.xlu0 %v964_v52, %s1019_s10 }
 0x1a5   : > { %687 = vst [vmem:[#allocation3 + $0x20] sm:$0xf] %v582_v56  ;;  %688 = vst [vmem:[#allocation3 + $0x28] sm:$0xf] %v965_v57  ;;  %626 = vrot.lane.b32.xlu1 %v582_v56, %s1019_s10  ;;  %v646_v60 = vmul.f32 %v644_v50, %v582_v56  ;;  %v609_v2 = vmul.f32 %v607_v58, %v582_v56  ;;  %v727_v3 = vmul.f32 %v725_v61, %v582_v56  ;;  %v585_v57 = vld [vmem:[%s1284_s3] sm:$0xf] }
 0x1a6   : > { %v671_v4 = vmul.f32 %v669_v62, %v582_v56  ;;  %v702_v10 = vmul.f32 %v700_v7, %v582_v56  ;;  %v764_v18 = vmul.f32 %v762_v16, %v582_v56 }
 0x1a7   : > { %v611_v15 = vcombine.high %v609_v2, %v609_v2  ;;  %v648_v17 = vcombine.high %v646_v60, %v646_v60  ;;  %v729_v19 = vcombine.high %v727_v3, %v727_v3 }
 0x1a8   : > { %649 = vrot.lane.b32.xlu0 %v646_v60, %s1022_s17  ;;  %v673_v9 = vcombine.low %v671_v4, %v671_v4  ;;  %v704_v12 = vcombine.low %v702_v10, %v702_v10  ;;  %v766_v6 = vcombine.high %v764_v18, %v764_v18 }
 0x1a9   : > { %612 = vrot.lane.b32.xlu1 %v609_v2, %s1020_s15 }
 0x1ac   : > { %730 = vrot.lane.b32.xlu0 %v727_v3, %s1024_s23 }
 0x1ad   : > { %676 = vrot.lane.b32.xlu1 %v671_v4, %s1021_s16 }
 0x1b0   : > { %674 = vrot.lane.b32.xlu0 %v673_v9, %s1021_s16 }
 0x1b1   : > { %707 = vrot.lane.b32.xlu1 %v702_v10, %s1023_s20 }
 0x1b4   : > { %705 = vrot.lane.b32.xlu0 %v704_v12, %s1023_s20 }
 0x1b5   : > { %614 = vrot.lane.b32.xlu1 %v611_v15, %s1020_s15 }
 0x1b8   : > { %742 = vrot.lane.b32.xlu0 %v964_v52, %s1025_s24 }
 0x1b9   : > { %651 = vrot.lane.b32.xlu1 %v648_v17, %s1022_s17 }
 0x1bc   : > { %767 = vrot.lane.b32.xlu0 %v764_v18, %s1026_s25 }
 0x1bd   : > { %732 = vrot.lane.b32.xlu1 %v729_v19, %s1024_s23 }
 0x1c0   : > { %789 = vperm.xlu0 %1000, %v786_v5  }
 0x1c1   : > { %744 = vrot.lane.b32.xlu1 %v582_v56, %s1025_s24  ;;  %s251_s24 = scalar_lea.vmem %s1287_s6, %s962_s28 }
 0x1c5   : > { %769 = vrot.lane.b32.xlu1 %v766_v6, %s1026_s25 }
 0x216   : > { %v625_v20 = vpop.permute.xlu0 %624 }
 0x217   : > { %631 = vst.msk [vmem:[#allocation3] sm:$0xf0] %vm304_vm1, %v625_v20  ;;  %v627_v21 = vpop.permute.xlu1 %626  ;;  %vm1292_vm1 = vcmask 904192  }
 0x218   : > { %v628_v22 = vsel %vm300_vm0, %v625_v20, %v627_v21  ;;  %vm1291_vm0 = vcmask 908288  }
 0x219   : > { %632 = vst [vmem:[#allocation3 + $0x8] sm:$0xf0] %v628_v22 }
 0x21a   : > { %v650_v23 = vpop.permute.xlu0 %649 }
 0x21b   : > { %656 = vst.msk [vmem:[#allocation3 + $0x10] sm:$0xf] %vm331_vm3, %v650_v23  ;;  %v613_v24 = vpop.permute.xlu1 %612 }
 0x21c   : > { %619 = vst.msk [vmem:[#allocation3] sm:$0xf] %vm290_vm2, %v613_v24 }
 0x21e   : > { %v731_v25 = vpop.permute.xlu0 %730 }
 0x21f   : > { %v677_v26 = vpop.permute.xlu1 %676 }
 0x222   : > { %v675_v27 = vpop.permute.xlu0 %674 }
 0x223   : > { %v678_v29 = vsel %vm354_vm7, %v675_v27, %v677_v26  ;;  %681 = vst.msk [vmem:[#allocation3 + $0x10] sm:$0xf0] %vm358_vm8, %v675_v27  ;;  %v708_v30 = vpop.permute.xlu1 %707  ;;  %v776_v45 = vld [vmem:[#allocation3] sm:$0xff] }
 0x224   : > { %682 = vst [vmem:[#allocation3 + $0x18] sm:$0xf0] %v678_v29  ;;  %713 = vst.msk [vmem:[#allocation3 + $0x28] sm:$0xf0] %vm392_vm6, %v708_v30 }
 0x226   : > { %v706_v31 = vpop.permute.xlu0 %705 }
 0x227   : > { %v709_v32 = vsel %vm387_vm10, %v706_v31, %v708_v30  ;;  %v615_v33 = vpop.permute.xlu1 %614 }
 0x228   : > { %712 = vst [vmem:[#allocation3 + $0x20] sm:$0xf0] %v709_v32  ;;  %v616_v1 = vsel %vm286_vm5, %v613_v24, %v615_v33 }
 0x229   : > { %620 = vst [vmem:[#allocation3 + $0x8] sm:$0xf] %v616_v1 }
 0x22a   : > { %v743_v38 = vpop.permute.xlu0 %742  ;;  %v778_v40 = vld [vmem:[#allocation3 + $0x10] sm:$0xff] }
 0x22b   : > { %v652_v34 = vpop.permute.xlu1 %651  ;;  %v976_v46 = vpack.c.bf16 %v778_v40, %v776_v45  ;;  %v781_v50 = vld [vmem:[#allocation3 + $0x28] sm:$0xff] }
 0x22c   : > { %v653_v35 = vsel %vm327_vm4, %v650_v23, %v652_v34 }
 0x22d   : > { %657 = vst [vmem:[#allocation3 + $0x18] sm:$0xf] %v653_v35 }
 0x22e   : > { %v768_v47 = vpop.permute.xlu0 %767 }
 0x22f   : > { %v733_v36 = vpop.permute.xlu1 %732  ;;  %v780_v53 = vld [vmem:[#allocation3 + $0x20] sm:$0xff] }
 0x230   : > { %v734_v37 = vsel %vm414_vm12, %v731_v25, %v733_v36  ;;  %738 = vst.msk [vmem:[#allocation3 + $0x38] sm:$0xf] %vm419_vm9, %v733_v36  ;;  %v777_v42 = vld [vmem:[#allocation3 + $0x8] sm:$0xff] }
 0x231   : > { %737 = vst [vmem:[#allocation3 + $0x30] sm:$0xf] %v734_v37 }
 0x233   : > { %v745_v39 = vpop.permute.xlu1 %744 }
 0x234   : > { %v746_v41 = vsel %vm428_vm14, %v743_v38, %v745_v39  ;;  %750 = vst.msk [vmem:[#allocation3 + $0x38] sm:$0xf0] %vm433_vm11, %v745_v39  ;;  %v779_v43 = vld [vmem:[#allocation3 + $0x18] sm:$0xff] }
 0x235   : > { %749 = vst [vmem:[#allocation3 + $0x30] sm:$0xf0] %v746_v41  ;;  %v974_v44 = vpack.c.bf16 %v779_v43, %v777_v42 }
 0x237   : > { %975 = vmatprep.subr.bf16.mxu1 %v974_v44  ;;  %v770_v48 = vpop.permute.xlu1 %769 }
 0x238   : > { %v771_v49 = vsel %vm1291_vm0, %v768_v47, %v770_v48  ;;  %775 = vst.msk [vmem:[#allocation3 + $0x48] sm:$0xf] %vm1292_vm1, %v770_v48  ;;  %977 = vmatpush1.bf16.msra.mxu1 %v976_v46 }
 0x239   : > { %774 = vst [vmem:[#allocation3 + $0x40] sm:$0xf] %v771_v49 }
 0x23b   : > { %v783_v51 = vld [vmem:[#allocation3 + $0x38] sm:$0xff] }
 0x23c   : > { %v978_v52 = vpack.c.bf16 %v783_v51, %v781_v50  ;;  %v782_v54 = vld [vmem:[#allocation3 + $0x30] sm:$0xff] }
 0x23d   : > { %v980_v55 = vpack.c.bf16 %v782_v54, %v780_v53 }
 0x23e   : > { %979 = vmatprep.subr.bf16.mxu1 %v978_v52 }
 0x23f   : > { %981 = vmatpush1.bf16.msra.mxu1 %v980_v55  ;;  %v785_v56 = vld [vmem:[#allocation3 + $0x48] sm:$0xf]  ;;  %v790_v59 = vpop.permute.xlu0 %789 }
 0x240   : > { %957 = vmatprep.subr.msk.mxu1 %vm482_vm13, %v785_v56  ;;  %v784_v58 = vld [vmem:[#allocation3 + $0x40] sm:$0xf] }
 0x243   : > { %958 = vmatpush1.msk.msra.mxu1 %vm482_vm13, %v784_v58 }
 0x244   : > { %959 = vmatmul.mubr.msk.f32.vlgmr.msra.gmra.mrb[0].mxu1 %vm478_vm15, %v585_v57 }
 0x317   : > { %v867_v60 = vpop.f32.mrb[0].mxu1 }
 0x318   : > { %v868_v61 = vadd.f32 %v867_v60, %v790_v59  ;;  %v869_v62 = vpop.f32.mrb[1].mxu1 }
 0x319   : > { %v870_v63 = vadd.f32 %v869_v62, %v790_v59 }
 0x31a   : > { %v875_v0 = vadd.f32 %v868_v61, %v1110_v8 }
 0x31b   : > { %v876_v2 = vadd.f32 %v870_v63, %v1139_v28 }
 0x31d   : > { %v879_v3 = vcombine.low %v875_v0, %v876_v2 }
 0x31f   : > { %881 = vst [vmem:[%s251_s24] sm:$0xff] %v879_v3 }
 0x320 PF: > { %s16_s21 = sadd.s32 1, %s1016_s21  }
 0x321   : > { %p13_p4 = scmp.ge.s32.totalorder %s16_s21, 4  }
 0x323   :  { %15 = sbr.rel (!%p13_p4) target bundleno = 1 (0x1), region = 75 }

</bundles_post_ra>
